<compile_context>
chip_gen: v6e
topology: v6e:2x2x1
jax: 0.10.0
libtpu: 0.0.40
codegen_flags: <defaults>
</compile_context>

<pallas_src>
import math
import numpy as np
import jax
import jax.numpy as jnp
from jax import lax
from jax.experimental import pallas as pl
from jax.experimental.pallas import tpu as pltpu  # noqa: F401  (TPU backend import)

# ----------------------- small synthetic configuration -----------------------
SEED       = 0
N_RNA      = 12
N_DIS      = 8
N_NODES    = N_RNA + N_DIS          # 20   (orig: 665)
F_IN       = 24                     # FNN input features (orig 665)
IN_DIM     = 32                     # transformer in_dim (orig 256)
OUT_DIM    = 32                     # attention hidden_dim
FOUT_DIM   = 32
HEADS      = 4
DEPTH      = IN_DIM // HEADS        # 8
DD         = DEPTH * DEPTH          # 64
OUTPUT_T   = 16                     # FN output dim (orig 64)
K_NMF      = 16                     # NMF rank (orig 128)
NMF_ITERS  = 50                     # (orig 500)
SA         = 2                      # number of GraphTransformerLayers
GTN_LAYERS = 7
EMB        = OUTPUT_T + K_NMF + N_NODES   # 52  MLP embedding size (orig 857)
N_PAIRS    = N_RNA * N_DIS          # 96
BN_EPS     = 1e-5
NEG_SLOPE  = 0.01
SCALE_ATTN = 1.0 / math.sqrt(DEPTH)


def _leaky(x):
    return jnp.where(x > 0, x, NEG_SLOPE * x)


# ------------------ constant 0/1 expansion matrices (host-built) ------------------
def _attention_expand_mats():
    # eq : (IN_DIM, HEADS*DD)   qR[n, h*DD + i*D + j] = q[n, h*D + i]
    # ek : (IN_DIM, HEADS*DD)   kT[n, h*DD + i*D + j] = k[n, h*D + j]   (also used for V)
    # rm : (HEADS*DD, IN_DIM)   merged[n, h*D + d] = sum_j prod[n, h*DD + d*D + j]
    eq = np.zeros((IN_DIM, HEADS * DD), np.float32)
    ek = np.zeros((IN_DIM, HEADS * DD), np.float32)
    rm = np.zeros((HEADS * DD, IN_DIM), np.float32)
    for h in range(HEADS):
        for i in range(DEPTH):
            for j in range(DEPTH):
                col = h * DD + i * DEPTH + j
                eq[h * DEPTH + i, col] = 1.0
                ek[h * DEPTH + j, col] = 1.0
                rm[col, h * DEPTH + i] = 1.0
    return jnp.asarray(eq), jnp.asarray(ek), jnp.asarray(rm)


def _pair_select_mats():
    # ert : (N_RNA, N_PAIRS)  selects rna row p//N_DIS for pair column p
    # edt : (N_DIS, N_PAIRS)  selects dis row p% N_DIS for pair column p
    ert = np.zeros((N_RNA, N_PAIRS), np.float32)
    edt = np.zeros((N_DIS, N_PAIRS), np.float32)
    for i in range(N_RNA):
        for j in range(N_DIS):
            p = i * N_DIS + j
            ert[i, p] = 1.0
            edt[j, p] = 1.0
    return jnp.asarray(ert), jnp.asarray(edt)


EQ_MAT, EK_MAT, R_MAT = _attention_expand_mats()
ERT_MAT, EDT_MAT = _pair_select_mats()


# ------------------------------- Pallas kernels -------------------------------
def _encoder_kernel(x_ref, fnn_w, fnn_b, res_w, res_b, qkv_w, qkv_b,
                    eq, ek, rm, out_w, out_b, o_w, o_b,
                    bn1_s, bn1_t, ffn1_w, ffn1_b, ffn2_w, ffn2_b,
                    bn2_s, bn2_t, fn_w, fn_b, out_ref):
    """FNN -> GraphTransformerLayer -> FN, fully fused (single VMEM-resident block)."""
    def mm(a, b):
        return jnp.dot(a, b, preferred_element_type=jnp.float32)

    # FNN + leaky_relu
    h0 = _leaky(mm(x_ref[...], fnn_w[...]) + fnn_b[...])             # (N, IN_DIM)

    # residual_layer1
    h_in1 = mm(h0, res_w[...]) + res_b[...]                          # (N, FOUT_DIM)

    # fused Q|K|V projection (one 96-lane matmul), static lane slices
    qkv = mm(h0, qkv_w[...]) + qkv_b[...]                            # (N, 3*IN_DIM)
    q = qkv[:, 0:IN_DIM]
    k = qkv[:, IN_DIM:2 * IN_DIM]
    v = qkv[:, 2 * IN_DIM:3 * IN_DIM]

    # scores[n, i*D+j] = sum_h q[n, h*D+i] * k[n, h*D+j]   (== torch Q @ K^T per node)
    qr = mm(q, eq[...])                                              # (N, HEADS*DD)
    kt = mm(k, ek[...])                                              # (N, HEADS*DD)
    prod = qr * kt
    scores = prod[:, 0:DD]
    for h in range(1, HEADS):
        scores = scores + prod[:, h * DD:(h + 1) * DD]
    scores = scores * SCALE_ATTN                                     # (N, DD)

    # torch.softmax(scores, dim=0) — softmax over the node axis (exact, no approx recip)
    m = jnp.max(scores, axis=0, keepdims=True)
    e = jnp.exp(scores - m)
    attn_w = e / jnp.sum(e, axis=0, keepdims=True)                   # (N, DD)

    # merged[n, h*D+d] = sum_j attn_w[n, d*D+j] * v[n, h*D+j]   (attn @ V + head merge)
    vt = mm(v, ek[...])                                              # (N, HEADS*DD)
    aw4 = jnp.concatenate([attn_w] * HEADS, axis=1)                  # (N, HEADS*DD)
    merged = mm(aw4 * vt, rm[...])                                   # (N, IN_DIM)

    # output_linear + sigmoid; dropout = identity (eval)
    attn = jax.nn.sigmoid(mm(merged, out_w[...]) + out_b[...])       # (N, OUT_DIM)
    # O + leaky_relu
    attn = _leaky(mm(attn, o_w[...]) + o_b[...])                     # (N, FOUT_DIM)
    # residual + BatchNorm1 (eval-mode affine)
    attn = (attn + h_in1) * bn1_s[...] + bn1_t[...]

    # FFN block
    h_in2 = attn
    f = _leaky(mm(attn, ffn1_w[...]) + ffn1_b[...])                  # (N, 2*FOUT_DIM)
    f = _leaky(mm(f, ffn2_w[...]) + ffn2_b[...])                     # (N, FOUT_DIM)
    f = (f + h_in2) * bn2_s[...] + bn2_t[...]                        # residual + BN2

    # FN + leaky_relu
    out_ref[...] = _leaky(mm(f, fn_w[...]) + fn_b[...])              # (N, OUTPUT_T)


def encoder_forward(params, x):
    # torch: `for conv in self.layers: h = conv(X)` — every layer reads the same X and
    # only the last result is used; eval-mode layers are pure, so run only the last one.
    lp = params["layers"][-1]
    qkv_w = jnp.concatenate([lp["q_w"], lp["k_w"], lp["v_w"]], axis=1)
    qkv_b = jnp.concatenate([lp["q_b"], lp["k_b"], lp["v_b"]], axis=1)
    return pl.pallas_call(
        _encoder_kernel,
        out_shape=jax.ShapeDtypeStruct((x.shape[0], OUTPUT_T), jnp.float32),
    )(x, params["fnn_w"], params["fnn_b"], lp["res_w"], lp["res_b"], qkv_w, qkv_b,
      EQ_MAT, EK_MAT, R_MAT, lp["out_w"], lp["out_b"], lp["O_w"], lp["O_b"],
      lp["bn1_scale"], lp["bn1_shift"], lp["ffn1_w"], lp["ffn1_b"],
      lp["ffn2_w"], lp["ffn2_b"], lp["bn2_scale"], lp["bn2_shift"],
      params["fn_w"], params["fn_b"])


def _gtn_kernel(a_ref, o_ref):
    """Whole GTN: layer0 = (2A)@(2A), then 6x [rownorm(H+I) @ (2A)], H kept resident."""
    n = a_ref.shape[0]
    a2 = 2.0 * a_ref[...]           # GTConv(A): softmax over a singleton dim -> 2*A exactly
    rows = lax.broadcasted_iota(jnp.int32, (n, n), 0)
    cols = lax.broadcasted_iota(jnp.int32, (n, n), 1)
    eye = jnp.where(rows == cols, 1.0, 0.0).astype(jnp.float32)      # hoisted, built once

    h = jnp.dot(a2, a2, preferred_element_type=jnp.float32)          # first GTLayer
    # Remaining 6 layers: static trip count, trace-time unrolled; H never leaves VMEM.
    for _ in range(GTN_LAYERS - 1):
        hh = h + eye
        deg = jnp.sum(hh, axis=1, keepdims=True)
        deg = jnp.where(deg <= 1e-10, 1.0, deg)
        h = jnp.dot(hh / deg, a2, preferred_element_type=jnp.float32)
    o_ref[...] = h


def gtn_forward(hnet):
    return pl.pallas_call(
        _gtn_kernel,
        out_shape=jax.ShapeDtypeStruct(hnet.shape, jnp.float32),
    )(hnet)


def _pair_mlp_kernel(rna_t, dis_t, ert, edt, w1t, b1t, w2t, b2t, w3t, b3t, w4t, o_ref):
    """All N_PAIRS pair features + 4-layer MLP at once; pair axis kept on lanes."""
    def mm(a, b):
        return jnp.dot(a, b, preferred_element_type=jnp.float32)

    # feats[:, i*N_DIS + j] = rna[i, :] * dis[j, :]
    feats = mm(rna_t[...], ert[...]) * mm(dis_t[...], edt[...])      # (EMB, N_PAIRS)
    h = _leaky(mm(w1t[...], feats) + b1t[...])                       # (EMB//2, N_PAIRS)
    h = _leaky(mm(w2t[...], h) + b2t[...])                           # (EMB//4, N_PAIRS)
    h = _leaky(mm(w3t[...], h) + b3t[...])                           # (EMB//6, N_PAIRS)
    o_ref[...] = jax.nn.sigmoid(mm(w4t[...], h))                     # (1, N_PAIRS) lane-dense


def pairwise_mlp(rna_emb, dis_emb, mlp_params):
    w1, b1, w2, b2, w3, b3, w4 = mlp_params
    out = pl.pallas_call(
        _pair_mlp_kernel,
        out_shape=jax.ShapeDtypeStruct((1, N_PAIRS), jnp.float32),
    )(rna_emb.T, dis_emb.T, ERT_MAT, EDT_MAT,
      w1.T, b1.T, w2.T, b2.T, w3.T, b3.T, w4.T)
    return out.reshape(N_PAIRS, 1)


# ------------------------ host-side preprocessing (numpy) ---------------------
def construct_hnet(rel, lnc, dis):
    mat1 = np.hstack([lnc, rel])
    mat2 = np.hstack([rel.T, dis])
    return np.vstack([mat1, mat2])


def l21_norm_np(mat):
    add = np.sum(mat ** 2, axis=1)
    return np.diag(1.0 / (2.0 * np.sqrt(add)))


def nmf_np(a, lnc, dis, beita, k, iterate):
    np.random.seed(SEED)
    rows, cols = a.shape
    c = np.abs(np.random.rand(rows, k))
    d = np.abs(np.random.rand(cols, k))
    diag_cf = np.diag(np.sum(lnc, axis=1))
    diag_df = np.diag(np.sum(dis, axis=1))
    a1 = lnc @ a
    a2 = a @ dis
    a = np.maximum(a1, a2)
    col_min = a.min(axis=0)
    denom = a.max(axis=0) - col_min
    denom = np.where(denom == 0.0, 1.0, denom)   # TODO(synk): guard absent in original (degenerate columns only)
    a = (a - col_min) / denom
    for _ in range(iterate):
        y = a - c @ d.T
        b = l21_norm_np(y)
        bad = (b @ a) @ d + beita * lnc @ c
        bcdd = b @ (c @ d.T @ d) + beita * diag_cf @ c
        c = c * (bad / bcdd)
        abc = a.T @ b @ c + beita * dis @ d
        dcbc = d @ (c.T @ b @ c) + beita * diag_df @ d
        d = d * (abc / dcbc)
    return c, d


def test_features_choose(rel_np, features_embedding, lnc_np, dis_np):
    r, d = nmf_np(rel_np, lnc_np, dis_np, 0.01, K_NMF, NMF_ITERS)
    rd = jnp.asarray(np.vstack([r, d]), jnp.float32)                       # (N, K_NMF)
    hnet = jnp.asarray(construct_hnet(rel_np, lnc_np, dis_np), jnp.float32)
    b = gtn_forward(hnet)                                                  # (N, N)
    emb = jnp.concatenate([features_embedding, rd], axis=1)
    emb = jnp.concatenate([emb, b], axis=1)                                # (N, EMB)
    return emb[:N_RNA, :], emb[N_RNA:, :]


# -------------------------------- parameters ----------------------------------
def init_params(key):
    keys = iter(jax.random.split(key, 64))

    def lin(fan_in, fan_out, bias=True):
        kw, kb = next(keys), next(keys)
        bound = 1.0 / math.sqrt(fan_in)
        w = jax.random.uniform(kw, (fan_in, fan_out), jnp.float32, -bound, bound)
        b = (jax.random.uniform(kb, (1, fan_out), jnp.float32, -bound, bound)
             if bias else None)
        return w, b

    params = {}
    params["fnn_w"], params["fnn_b"] = lin(F_IN, IN_DIM)

    bn_scale = jnp.full((1, FOUT_DIM), 1.0 / math.sqrt(1.0 + BN_EPS), jnp.float32)
    bn_shift = jnp.zeros((1, FOUT_DIM), jnp.float32)
    layers = []
    for _ in range(SA):
        lp = {}
        lp["res_w"], lp["res_b"] = lin(IN_DIM, FOUT_DIM)
        lp["q_w"], lp["q_b"] = lin(IN_DIM, IN_DIM)
        lp["k_w"], lp["k_b"] = lin(IN_DIM, IN_DIM)
        lp["v_w"], lp["v_b"] = lin(IN_DIM, IN_DIM)
        lp["out_w"], lp["out_b"] = lin(IN_DIM, OUT_DIM)
        lp["O_w"], lp["O_b"] = lin(OUT_DIM, FOUT_DIM)
        lp["ffn1_w"], lp["ffn1_b"] = lin(FOUT_DIM, 2 * FOUT_DIM)
        lp["ffn2_w"], lp["ffn2_b"] = lin(2 * FOUT_DIM, FOUT_DIM)
        lp["bn1_scale"], lp["bn1_shift"] = bn_scale, bn_shift
        lp["bn2_scale"], lp["bn2_shift"] = bn_scale, bn_shift
        layers.append(lp)
    params["layers"] = layers
    params["fn_w"], params["fn_b"] = lin(FOUT_DIM, OUTPUT_T)

    w1, b1 = lin(EMB, EMB // 2)
    w2, b2 = lin(EMB // 2, EMB // 4)
    w3, b3 = lin(EMB // 4, EMB // 6)
    w4, _ = lin(EMB // 6, 1, bias=False)
    params["mlp"] = (w1, b1, w2, b2, w3, b3, w4)
    return params


# --------------------------------- forward ------------------------------------
def gtm_net_forward(params, x, edge_index, rel_np, lnc_np, dis_np):
    del edge_index  # unused in the original forward as well
    outputs = encoder_forward(params, x)                                   # (N, OUTPUT_T)
    rna_emb, dis_emb = test_features_choose(rel_np, outputs, lnc_np, dis_np)
    return pairwise_mlp(rna_emb, dis_emb, params["mlp"])                   # (N_RNA*N_DIS, 1)


# ----------------------------------- main --------------------------------------
if __name__ == "__main__":
    key = jax.random.PRNGKey(0)
    k_x, k_rel, k_lnc, k_dis, k_par = jax.random.split(key, 5)

    x = jax.random.normal(k_x, (N_NODES, F_IN), jnp.float32)
    rel_np = np.asarray(jax.random.uniform(k_rel, (N_RNA, N_DIS)) < 0.5, dtype=np.float64)

    def sym_sim(k, n):
        s = np.abs(np.asarray(jax.random.normal(k, (n, n)), dtype=np.float64))
        s = (s + s.T) / 2.0
        np.fill_diagonal(s, 1.0)
        return s

    lnc_np = sym_sim(k_lnc, N_RNA)
    dis_np = sym_sim(k_dis, N_DIS)
    edge_index = jnp.zeros((2, 16), jnp.int32)   # present in the signature, unused

    params = init_params(k_par)
    pred = gtm_net_forward(params, x, edge_index, rel_np, lnc_np, dis_np)
    pred = jax.block_until_ready(pred)

    assert pred.shape == (N_RNA * N_DIS, 1), pred.shape
    assert bool(jnp.all(jnp.isfinite(pred)))
    print("KERNEL_OK")
</pallas_src>

<mosaic_0001>
module attributes {stable_mosaic.version = 11 : i64} {
  func.func @_encoder_kernel(%arg0: memref<20x24xf32, #tpu.memory_space<vmem>>, %arg1: memref<24x32xf32, #tpu.memory_space<vmem>>, %arg2: memref<1x32xf32, #tpu.memory_space<vmem>>, %arg3: memref<32x32xf32, #tpu.memory_space<vmem>>, %arg4: memref<1x32xf32, #tpu.memory_space<vmem>>, %arg5: memref<32x96xf32, #tpu.memory_space<vmem>>, %arg6: memref<1x96xf32, #tpu.memory_space<vmem>>, %arg7: memref<32x256xf32, #tpu.memory_space<vmem>>, %arg8: memref<32x256xf32, #tpu.memory_space<vmem>>, %arg9: memref<256x32xf32, #tpu.memory_space<vmem>>, %arg10: memref<32x32xf32, #tpu.memory_space<vmem>>, %arg11: memref<1x32xf32, #tpu.memory_space<vmem>>, %arg12: memref<32x32xf32, #tpu.memory_space<vmem>>, %arg13: memref<1x32xf32, #tpu.memory_space<vmem>>, %arg14: memref<1x32xf32, #tpu.memory_space<vmem>>, %arg15: memref<1x32xf32, #tpu.memory_space<vmem>>, %arg16: memref<32x64xf32, #tpu.memory_space<vmem>>, %arg17: memref<1x64xf32, #tpu.memory_space<vmem>>, %arg18: memref<64x32xf32, #tpu.memory_space<vmem>>, %arg19: memref<1x32xf32, #tpu.memory_space<vmem>>, %arg20: memref<1x32xf32, #tpu.memory_space<vmem>>, %arg21: memref<1x32xf32, #tpu.memory_space<vmem>>, %arg22: memref<32x16xf32, #tpu.memory_space<vmem>>, %arg23: memref<1x16xf32, #tpu.memory_space<vmem>>, %arg24: memref<20x16xf32, #tpu.memory_space<vmem>>) attributes {dimension_semantics = [], scalar_prefetch = 0 : i64, scratch_operands = 0 : i64, tpu.core_type = #tpu.core_type<tc>} {
    %c0 = arith.constant 0 : index
    %c0_0 = arith.constant 0 : index
    %0 = vector.load %arg0[%c0, %c0_0] : memref<20x24xf32, #tpu.memory_space<vmem>>, vector<20x24xf32>
    %c0_1 = arith.constant 0 : index
    %c0_2 = arith.constant 0 : index
    %1 = vector.load %arg1[%c0_1, %c0_2] : memref<24x32xf32, #tpu.memory_space<vmem>>, vector<24x32xf32>
    %cst = arith.constant dense<0.000000e+00> : vector<20x32xf32>
    %2 = tpu.matmul %0, %1, %cst {dimension_numbers = #tpu.dot_dimension_numbers<[1], [0], [0], [1], [0, 0, 1, 1], [], []>} : vector<20x24xf32>, vector<24x32xf32>, vector<20x32xf32> -> vector<20x32xf32>
    %c0_3 = arith.constant 0 : index
    %c0_4 = arith.constant 0 : index
    %3 = vector.load %arg2[%c0_3, %c0_4] : memref<1x32xf32, #tpu.memory_space<vmem>>, vector<1x32xf32>
    %4 = vector.broadcast %3 : vector<1x32xf32> to vector<20x32xf32>
    %5 = arith.addf %2, %4 : vector<20x32xf32>
    %cst_5 = arith.constant 0.000000e+00 : f32
    %6 = vector.broadcast %cst_5 : f32 to vector<20x32xf32>
    %7 = arith.cmpf ogt, %5, %6 : vector<20x32xf32>
    %cst_6 = arith.constant 0.00999999977 : f32
    %8 = vector.broadcast %cst_6 : f32 to vector<20x32xf32>
    %9 = arith.mulf %8, %5 : vector<20x32xf32>
    %10 = arith.select %7, %5, %9 : vector<20x32xi1>, vector<20x32xf32>
    %c0_7 = arith.constant 0 : index
    %c0_8 = arith.constant 0 : index
    %11 = vector.load %arg3[%c0_7, %c0_8] : memref<32x32xf32, #tpu.memory_space<vmem>>, vector<32x32xf32>
    %cst_9 = arith.constant dense<0.000000e+00> : vector<20x32xf32>
    %12 = tpu.matmul %10, %11, %cst_9 {dimension_numbers = #tpu.dot_dimension_numbers<[1], [0], [0], [1], [0, 0, 1, 1], [], []>} : vector<20x32xf32>, vector<32x32xf32>, vector<20x32xf32> -> vector<20x32xf32>
    %c0_10 = arith.constant 0 : index
    %c0_11 = arith.constant 0 : index
    %13 = vector.load %arg4[%c0_10, %c0_11] : memref<1x32xf32, #tpu.memory_space<vmem>>, vector<1x32xf32>
    %14 = vector.broadcast %13 : vector<1x32xf32> to vector<20x32xf32>
    %15 = arith.addf %12, %14 : vector<20x32xf32>
    %c0_12 = arith.constant 0 : index
    %c0_13 = arith.constant 0 : index
    %16 = vector.load %arg5[%c0_12, %c0_13] : memref<32x96xf32, #tpu.memory_space<vmem>>, vector<32x96xf32>
    %cst_14 = arith.constant dense<0.000000e+00> : vector<20x96xf32>
    %17 = tpu.matmul %10, %16, %cst_14 {dimension_numbers = #tpu.dot_dimension_numbers<[1], [0], [0], [1], [0, 0, 1, 1], [], []>} : vector<20x32xf32>, vector<32x96xf32>, vector<20x96xf32> -> vector<20x96xf32>
    %c0_15 = arith.constant 0 : index
    %c0_16 = arith.constant 0 : index
    %18 = vector.load %arg6[%c0_15, %c0_16] : memref<1x96xf32, #tpu.memory_space<vmem>>, vector<1x96xf32>
    %19 = vector.broadcast %18 : vector<1x96xf32> to vector<20x96xf32>
    %20 = arith.addf %17, %19 : vector<20x96xf32>
    %21 = vector.extract_strided_slice %20 {offsets = [0, 0], sizes = [20, 32], strides = [1, 1]} : vector<20x96xf32> to vector<20x32xf32>
    %22 = vector.extract_strided_slice %20 {offsets = [0, 32], sizes = [20, 32], strides = [1, 1]} : vector<20x96xf32> to vector<20x32xf32>
    %23 = vector.extract_strided_slice %20 {offsets = [0, 64], sizes = [20, 32], strides = [1, 1]} : vector<20x96xf32> to vector<20x32xf32>
    %c0_17 = arith.constant 0 : index
    %c0_18 = arith.constant 0 : index
    %24 = vector.load %arg7[%c0_17, %c0_18] : memref<32x256xf32, #tpu.memory_space<vmem>>, vector<32x256xf32>
    %cst_19 = arith.constant dense<0.000000e+00> : vector<20x256xf32>
    %25 = tpu.matmul %21, %24, %cst_19 {dimension_numbers = #tpu.dot_dimension_numbers<[1], [0], [0], [1], [0, 0, 1, 1], [], []>} : vector<20x32xf32>, vector<32x256xf32>, vector<20x256xf32> -> vector<20x256xf32>
    %c0_20 = arith.constant 0 : index
    %c0_21 = arith.constant 0 : index
    %26 = vector.load %arg8[%c0_20, %c0_21] : memref<32x256xf32, #tpu.memory_space<vmem>>, vector<32x256xf32>
    %cst_22 = arith.constant dense<0.000000e+00> : vector<20x256xf32>
    %27 = tpu.matmul %22, %26, %cst_22 {dimension_numbers = #tpu.dot_dimension_numbers<[1], [0], [0], [1], [0, 0, 1, 1], [], []>} : vector<20x32xf32>, vector<32x256xf32>, vector<20x256xf32> -> vector<20x256xf32>
    %28 = arith.mulf %25, %27 : vector<20x256xf32>
    %29 = vector.extract_strided_slice %28 {offsets = [0, 0], sizes = [20, 64], strides = [1, 1]} : vector<20x256xf32> to vector<20x64xf32>
    %30 = vector.extract_strided_slice %28 {offsets = [0, 64], sizes = [20, 64], strides = [1, 1]} : vector<20x256xf32> to vector<20x64xf32>
    %31 = arith.addf %29, %30 : vector<20x64xf32>
    %32 = vector.extract_strided_slice %28 {offsets = [0, 128], sizes = [20, 64], strides = [1, 1]} : vector<20x256xf32> to vector<20x64xf32>
    %33 = arith.addf %31, %32 : vector<20x64xf32>
    %34 = vector.extract_strided_slice %28 {offsets = [0, 192], sizes = [20, 64], strides = [1, 1]} : vector<20x256xf32> to vector<20x64xf32>
    %35 = arith.addf %33, %34 : vector<20x64xf32>
    %cst_23 = arith.constant 0.353553385 : f32
    %36 = vector.broadcast %cst_23 : f32 to vector<20x64xf32>
    %37 = arith.mulf %35, %36 : vector<20x64xf32>
    %cst_24 = arith.constant dense<0xFF800000> : vector<64xf32>
    %38 = vector.multi_reduction <maximumf>, %37, %cst_24 [0] : vector<20x64xf32> to vector<64xf32>
    %39 = vector.shape_cast %38 : vector<64xf32> to vector<1x64xf32>
    %40 = vector.broadcast %39 : vector<1x64xf32> to vector<20x64xf32>
    %41 = arith.subf %37, %40 : vector<20x64xf32>
    %42 = math.exp %41 : vector<20x64xf32>
    %cst_25 = arith.constant dense<0.000000e+00> : vector<64xf32>
    %43 = vector.multi_reduction <add>, %42, %cst_25 [0] : vector<20x64xf32> to vector<64xf32>
    %44 = vector.shape_cast %43 : vector<64xf32> to vector<1x64xf32>
    %45 = vector.broadcast %44 : vector<1x64xf32> to vector<20x64xf32>
    %46 = arith.divf %42, %45 : vector<20x64xf32>
    %c0_26 = arith.constant 0 : index
    %c0_27 = arith.constant 0 : index
    %47 = vector.load %arg8[%c0_26, %c0_27] : memref<32x256xf32, #tpu.memory_space<vmem>>, vector<32x256xf32>
    %cst_28 = arith.constant dense<0.000000e+00> : vector<20x256xf32>
    %48 = tpu.matmul %23, %47, %cst_28 {dimension_numbers = #tpu.dot_dimension_numbers<[1], [0], [0], [1], [0, 0, 1, 1], [], []>} : vector<20x32xf32>, vector<32x256xf32>, vector<20x256xf32> -> vector<20x256xf32>
    %49 = tpu.concatenate %46, %46, %46, %46 in 1 : vector<20x64xf32>, vector<20x64xf32>, vector<20x64xf32>, vector<20x64xf32> -> vector<20x256xf32>
    %50 = arith.mulf %49, %48 : vector<20x256xf32>
    %c0_29 = arith.constant 0 : index
    %c0_30 = arith.constant 0 : index
    %51 = vector.load %arg9[%c0_29, %c0_30] : memref<256x32xf32, #tpu.memory_space<vmem>>, vector<256x32xf32>
    %cst_31 = arith.constant dense<0.000000e+00> : vector<20x32xf32>
    %52 = tpu.matmul %50, %51, %cst_31 {dimension_numbers = #tpu.dot_dimension_numbers<[1], [0], [0], [1], [0, 0, 1, 1], [], []>} : vector<20x256xf32>, vector<256x32xf32>, vector<20x32xf32> -> vector<20x32xf32>
    %c0_32 = arith.constant 0 : index
    %c0_33 = arith.constant 0 : index
    %53 = vector.load %arg10[%c0_32, %c0_33] : memref<32x32xf32, #tpu.memory_space<vmem>>, vector<32x32xf32>
    %cst_34 = arith.constant dense<0.000000e+00> : vector<20x32xf32>
    %54 = tpu.matmul %52, %53, %cst_34 {dimension_numbers = #tpu.dot_dimension_numbers<[1], [0], [0], [1], [0, 0, 1, 1], [], []>} : vector<20x32xf32>, vector<32x32xf32>, vector<20x32xf32> -> vector<20x32xf32>
    %c0_35 = arith.constant 0 : index
    %c0_36 = arith.constant 0 : index
    %55 = vector.load %arg11[%c0_35, %c0_36] : memref<1x32xf32, #tpu.memory_space<vmem>>, vector<1x32xf32>
    %56 = vector.broadcast %55 : vector<1x32xf32> to vector<20x32xf32>
    %57 = arith.addf %54, %56 : vector<20x32xf32>
    %58 = arith.negf %57 : vector<20x32xf32>
    %59 = math.exp %58 : vector<20x32xf32>
    %cst_37 = arith.constant 1.000000e+00 : f32
    %60 = vector.broadcast %cst_37 : f32 to vector<20x32xf32>
    %61 = arith.addf %60, %59 : vector<20x32xf32>
    %62 = arith.divf %60, %61 : vector<20x32xf32>
    %c0_38 = arith.constant 0 : index
    %c0_39 = arith.constant 0 : index
    %63 = vector.load %arg12[%c0_38, %c0_39] : memref<32x32xf32, #tpu.memory_space<vmem>>, vector<32x32xf32>
    %cst_40 = arith.constant dense<0.000000e+00> : vector<20x32xf32>
    %64 = tpu.matmul %62, %63, %cst_40 {dimension_numbers = #tpu.dot_dimension_numbers<[1], [0], [0], [1], [0, 0, 1, 1], [], []>} : vector<20x32xf32>, vector<32x32xf32>, vector<20x32xf32> -> vector<20x32xf32>
    %c0_41 = arith.constant 0 : index
    %c0_42 = arith.constant 0 : index
    %65 = vector.load %arg13[%c0_41, %c0_42] : memref<1x32xf32, #tpu.memory_space<vmem>>, vector<1x32xf32>
    %66 = vector.broadcast %65 : vector<1x32xf32> to vector<20x32xf32>
    %67 = arith.addf %64, %66 : vector<20x32xf32>
    %cst_43 = arith.constant 0.000000e+00 : f32
    %68 = vector.broadcast %cst_43 : f32 to vector<20x32xf32>
    %69 = arith.cmpf ogt, %67, %68 : vector<20x32xf32>
    %cst_44 = arith.constant 0.00999999977 : f32
    %70 = vector.broadcast %cst_44 : f32 to vector<20x32xf32>
    %71 = arith.mulf %70, %67 : vector<20x32xf32>
    %72 = arith.select %69, %67, %71 : vector<20x32xi1>, vector<20x32xf32>
    %73 = arith.addf %72, %15 : vector<20x32xf32>
    %c0_45 = arith.constant 0 : index
    %c0_46 = arith.constant 0 : index
    %74 = vector.load %arg14[%c0_45, %c0_46] : memref<1x32xf32, #tpu.memory_space<vmem>>, vector<1x32xf32>
    %75 = vector.broadcast %74 : vector<1x32xf32> to vector<20x32xf32>
    %76 = arith.mulf %73, %75 : vector<20x32xf32>
    %c0_47 = arith.constant 0 : index
    %c0_48 = arith.constant 0 : index
    %77 = vector.load %arg15[%c0_47, %c0_48] : memref<1x32xf32, #tpu.memory_space<vmem>>, vector<1x32xf32>
    %78 = vector.broadcast %77 : vector<1x32xf32> to vector<20x32xf32>
    %79 = arith.addf %76, %78 : vector<20x32xf32>
    %c0_49 = arith.constant 0 : index
    %c0_50 = arith.constant 0 : index
    %80 = vector.load %arg16[%c0_49, %c0_50] : memref<32x64xf32, #tpu.memory_space<vmem>>, vector<32x64xf32>
    %cst_51 = arith.constant dense<0.000000e+00> : vector<20x64xf32>
    %81 = tpu.matmul %79, %80, %cst_51 {dimension_numbers = #tpu.dot_dimension_numbers<[1], [0], [0], [1], [0, 0, 1, 1], [], []>} : vector<20x32xf32>, vector<32x64xf32>, vector<20x64xf32> -> vector<20x64xf32>
    %c0_52 = arith.constant 0 : index
    %c0_53 = arith.constant 0 : index
    %82 = vector.load %arg17[%c0_52, %c0_53] : memref<1x64xf32, #tpu.memory_space<vmem>>, vector<1x64xf32>
    %83 = vector.broadcast %82 : vector<1x64xf32> to vector<20x64xf32>
    %84 = arith.addf %81, %83 : vector<20x64xf32>
    %cst_54 = arith.constant 0.000000e+00 : f32
    %85 = vector.broadcast %cst_54 : f32 to vector<20x64xf32>
    %86 = arith.cmpf ogt, %84, %85 : vector<20x64xf32>
    %cst_55 = arith.constant 0.00999999977 : f32
    %87 = vector.broadcast %cst_55 : f32 to vector<20x64xf32>
    %88 = arith.mulf %87, %84 : vector<20x64xf32>
    %89 = arith.select %86, %84, %88 : vector<20x64xi1>, vector<20x64xf32>
    %c0_56 = arith.constant 0 : index
    %c0_57 = arith.constant 0 : index
    %90 = vector.load %arg18[%c0_56, %c0_57] : memref<64x32xf32, #tpu.memory_space<vmem>>, vector<64x32xf32>
    %cst_58 = arith.constant dense<0.000000e+00> : vector<20x32xf32>
    %91 = tpu.matmul %89, %90, %cst_58 {dimension_numbers = #tpu.dot_dimension_numbers<[1], [0], [0], [1], [0, 0, 1, 1], [], []>} : vector<20x64xf32>, vector<64x32xf32>, vector<20x32xf32> -> vector<20x32xf32>
    %c0_59 = arith.constant 0 : index
    %c0_60 = arith.constant 0 : index
    %92 = vector.load %arg19[%c0_59, %c0_60] : memref<1x32xf32, #tpu.memory_space<vmem>>, vector<1x32xf32>
    %93 = vector.broadcast %92 : vector<1x32xf32> to vector<20x32xf32>
    %94 = arith.addf %91, %93 : vector<20x32xf32>
    %cst_61 = arith.constant 0.000000e+00 : f32
    %95 = vector.broadcast %cst_61 : f32 to vector<20x32xf32>
    %96 = arith.cmpf ogt, %94, %95 : vector<20x32xf32>
    %cst_62 = arith.constant 0.00999999977 : f32
    %97 = vector.broadcast %cst_62 : f32 to vector<20x32xf32>
    %98 = arith.mulf %97, %94 : vector<20x32xf32>
    %99 = arith.select %96, %94, %98 : vector<20x32xi1>, vector<20x32xf32>
    %100 = arith.addf %99, %79 : vector<20x32xf32>
    %c0_63 = arith.constant 0 : index
    %c0_64 = arith.constant 0 : index
    %101 = vector.load %arg20[%c0_63, %c0_64] : memref<1x32xf32, #tpu.memory_space<vmem>>, vector<1x32xf32>
    %102 = vector.broadcast %101 : vector<1x32xf32> to vector<20x32xf32>
    %103 = arith.mulf %100, %102 : vector<20x32xf32>
    %c0_65 = arith.constant 0 : index
    %c0_66 = arith.constant 0 : index
    %104 = vector.load %arg21[%c0_65, %c0_66] : memref<1x32xf32, #tpu.memory_space<vmem>>, vector<1x32xf32>
    %105 = vector.broadcast %104 : vector<1x32xf32> to vector<20x32xf32>
    %106 = arith.addf %103, %105 : vector<20x32xf32>
    %c0_67 = arith.constant 0 : index
    %c0_68 = arith.constant 0 : index
    %107 = vector.load %arg22[%c0_67, %c0_68] : memref<32x16xf32, #tpu.memory_space<vmem>>, vector<32x16xf32>
    %cst_69 = arith.constant dense<0.000000e+00> : vector<20x16xf32>
    %108 = tpu.matmul %106, %107, %cst_69 {dimension_numbers = #tpu.dot_dimension_numbers<[1], [0], [0], [1], [0, 0, 1, 1], [], []>} : vector<20x32xf32>, vector<32x16xf32>, vector<20x16xf32> -> vector<20x16xf32>
    %c0_70 = arith.constant 0 : index
    %c0_71 = arith.constant 0 : index
    %109 = vector.load %arg23[%c0_70, %c0_71] : memref<1x16xf32, #tpu.memory_space<vmem>>, vector<1x16xf32>
    %110 = vector.broadcast %109 : vector<1x16xf32> to vector<20x16xf32>
    %111 = arith.addf %108, %110 : vector<20x16xf32>
    %cst_72 = arith.constant 0.000000e+00 : f32
    %112 = vector.broadcast %cst_72 : f32 to vector<20x16xf32>
    %113 = arith.cmpf ogt, %111, %112 : vector<20x16xf32>
    %cst_73 = arith.constant 0.00999999977 : f32
    %114 = vector.broadcast %cst_73 : f32 to vector<20x16xf32>
    %115 = arith.mulf %114, %111 : vector<20x16xf32>
    %116 = arith.select %113, %111, %115 : vector<20x16xi1>, vector<20x16xf32>
    %c0_74 = arith.constant 0 : index
    %c0_75 = arith.constant 0 : index
    %117 = vector.load %arg24[%c0_74, %c0_75] : memref<20x16xf32, #tpu.memory_space<vmem>>, vector<20x16xf32>
    tpu.vector_store %arg24[%c0_74, %c0_75], %116 {strides = array<i32>} : memref<20x16xf32, #tpu.memory_space<vmem>>, vector<20x16xf32>,
    return
  }
}

</mosaic_0001>

<bundles_post_ra>
// kernel: tpu_custom_call.1
= control target key start
LH: loop header
LB: loop body
LE: loop exit
PB: predicated region body
PF: predicated region fallthrough
CT: control target
= control target key end

     0   :  { %v1818_v0 = vmov 0.0   ;;  %vm1819_vm0 = vmmov 0   ;;  %vm90_vm1 = vcmask 195584   ;;  %vm200_vm3 = vcmask 261120   ;;  %s1820_s26 = smov 96   ;;  %s2441_s1 = inlined_call_operand.vmem [shape: f32[24,32], index: 1, kind: input, shape index: {}]   ;;  %s2442_s3 = inlined_call_operand.vmem [shape: f32[32,32], index: 3, kind: input, shape index: {}]   ;;  %s2443_s0 = inlined_call_operand.vmem [shape: f32[20,24], index: 0, kind: input, shape index: {}]   ;;  %s2444_s5 = inlined_call_operand.vmem [shape: f32[32,96], index: 5, kind: input, shape index: {}]   ;;  %s2445_s7 = inlined_call_operand.vmem [shape: f32[32,256], index: 7, kind: input, shape index: {}]   ;;  %s2446_s2 = inlined_call_operand.vmem [shape: f32[1,32], index: 2, kind: input, shape index: {}]   ;;  %s2447_s8 = inlined_call_operand.vmem [shape: f32[32,256], index: 8, kind: input, shape index: {}]   ;;  %s2448_s6 = inlined_call_operand.vmem [shape: f32[1,96], index: 6, kind: input, shape index: {}]   ;;  %s2449_s9 = inlined_call_operand.vmem [shape: f32[256,32], index: 9, kind: input, shape index: {}]   ;;  %s2450_s10 = inlined_call_operand.vmem [shape: f32[32,32], index: 10, kind: input, shape index: {}]   ;;  %s2451_s12 = inlined_call_operand.vmem [shape: f32[32,32], index: 12, kind: input, shape index: {}]   ;;  %s2452_s11 = inlined_call_operand.vmem [shape: f32[1,32], index: 11, kind: input, shape index: {}]   ;;  %s2453_s16 = inlined_call_operand.vmem [shape: f32[32,64], index: 16, kind: input, shape index: {}]   ;;  %s2454_s18 = inlined_call_operand.vmem [shape: f32[64,32], index: 18, kind: input, shape index: {}]   ;;  %s2455_s13 = inlined_call_operand.vmem [shape: f32[1,32], index: 13, kind: input, shape index: {}]   ;;  %s2456_s4 = inlined_call_operand.vmem [shape: f32[1,32], index: 4, kind: input, shape index: {}]   ;;  %s2457_s14 = inlined_call_operand.vmem [shape: f32[1,32], index: 14, kind: input, shape index: {}]   ;;  %s2458_s15 = inlined_call_operand.vmem [shape: f32[1,32], index: 15, kind: input, shape index: {}]   ;;  %s2459_s17 = inlined_call_operand.vmem [shape: f32[1,64], index: 17, kind: input, shape index: {}]   ;;  %s2460_s22 = inlined_call_operand.vmem [shape: f32[32,16], index: 22, kind: input, shape index: {}]   ;;  %s2461_s19 = inlined_call_operand.vmem [shape: f32[1,32], index: 19, kind: input, shape index: {}]   ;;  %s2462_s20 = inlined_call_operand.vmem [shape: f32[1,32], index: 20, kind: input, shape index: {}]   ;;  %s2463_s21 = inlined_call_operand.vmem [shape: f32[1,32], index: 21, kind: input, shape index: {}]   ;;  %s2464_s23 = inlined_call_operand.vmem [shape: f32[1,16], index: 23, kind: input, shape index: {}]   ;;  %s2465_s24 = inlined_call_operand.vmem [shape: f32[20,16], index: 24, kind: output, shape index: {}]  }
   0x1   :  { %2473 = sst [smem:[#allocation2_spill]] %s2441_s1  ;;  %1652 = vmatprep.subr.mxu0 %v1818_v0  ;;  %1658 = vmatprep.mubr.msk.f32.mxu0 %vm1819_vm0, %v1818_v0  ;;  %vm626_vm6 = vcmask 523264   ;;  %vm629_vm7 = vcmask 519168  }
   0x2   :  { %2474 = sst [smem:[#allocation3_spill]] %s2442_s3  ;;  %1667 = vmatprep.subr.mxu1 %v1818_v0  ;;  %1675 = vmatprep.mubr.msk.f32.mxu1 %vm1819_vm0, %v1818_v0 }
   0x3   :  { %2475 = sst [smem:[#allocation4_spill]] %s2443_s0 }
   0x4   :  { %2476 = sst [smem:[#allocation5_spill]] %s2444_s5 }
   0x5   :  { %2477 = sst [smem:[#allocation6_spill]] %s2445_s7 }
   0x6   :  { %2478 = sst [smem:[#allocation7_spill]] %s2446_s2 }
   0x7   :  { %2479 = sst [smem:[#allocation8_spill]] %s2447_s8 }
   0x8   :  { %2480 = sst [smem:[#allocation9_spill]] %s2448_s6 }
   0x9   :  { %2481 = sst [smem:[#allocation10_spill]] %s2449_s9 }
   0xa   :  { %s2482_s27 = sld [smem:[#allocation2_spill]] }
   0xb   :  { %s2483_s30 = sld [smem:[#allocation3_spill]] }
   0xc   :  { %s2484_s9 = sld [smem:[#allocation4_spill]] }
   0xd   :  { %s2485_s2 = sld [smem:[#allocation5_spill]] }
   0xe   :  { %s2486_s29 = sld [smem:[#allocation6_spill]] }
   0xf   :  { %s2487_s5 = sld [smem:[#allocation7_spill]] }
  0x10   :  { %v82_v1 = vld [vmem:[%s2482_s27 + $0x10] sm:$0xff]  ;;  %v81_v2 = vld [vmem:[%s2482_s27 + $0x8] sm:$0xff]  ;;  %v80_v3 = vld [vmem:[%s2482_s27] sm:$0xff]  ;;  %s2488_s25 = sld [smem:[#allocation8_spill]] }
  0x11   :  { %1653 = vmatpush3.msra.mxu0 %v82_v1  ;;  %v192_v4 = vld [vmem:[%s2483_s30 + $0x18] sm:$0xff]  ;;  %v191_v10 = vld [vmem:[%s2483_s30 + $0x10] sm:$0xff]  ;;  %v190_v12 = vld [vmem:[%s2483_s30 + $0x8] sm:$0xff] }
  0x12   :  { %1654 = vmatprep.subr.mxu0 %v1818_v0  ;;  %v77_v5 = vld [vmem:[%s2484_s9] sm:$0xff]  ;;  %1668 = vmatpush3.msra.mxu1 %v192_v4  ;;  %v78_v8 = vld [vmem:[%s2484_s9 + $0x8] sm:$0xff]  ;;  %v79_v9 = vld [vmem:[%s2484_s9 + $0x10] sm:$0xf]  ;;  %s2489_s9 = sld [smem:[#allocation9_spill]] }
  0x13   :  { %1655 = vmatpush3.msra.mxu0 %v81_v2  ;;  %v293_v6 = vld [vmem:[%s2485_s2 + $0x18] sm:$0xff]  ;;  %1669 = vmatprep.subr.mxu1 %v1818_v0  ;;  %v292_v7 = vld [vmem:[%s2485_s2 + $0x10] sm:$0xff]  ;;  %v291_v11 = vld [vmem:[%s2485_s2 + $0x8] sm:$0xff] }
  0x14   :  { %1656 = vmatprep.subr.mxu0 %v1818_v0  ;;  %1670 = vmatpush3.msra.mxu1 %v191_v10  ;;  %v290_v13 = vld [vmem:[%s2485_s2] sm:$0xff]  ;;  %v388_v15 = vld [vmem:[%s2486_s29 + $0x38] sm:$0xff]  ;;  %v387_v24 = vld [vmem:[%s2486_s29 + $0x30] sm:$0xff] }
  0x15   :  { %1657 = vmatpush3.msra.mxu0 %v80_v3  ;;  %1671 = vmatprep.subr.mxu1 %v1818_v0  ;;  %v189_v14 = vld [vmem:[%s2483_s30] sm:$0xff]  ;;  %v386_v26 = vld [vmem:[%s2486_s29 + $0x28] sm:$0xff]  ;;  %v384_v33 = vld [vmem:[%s2486_s29 + $0x18] sm:$0xff] }
  0x16   :  { %1659 = vmatmul.mubr.msk.f32.vlgmr.msra.gmra.mxu0 %vm90_vm1, %v77_v5  ;;  %1684 = vmatprep.subr.mxu0 %v1818_v0  ;;  %v1504_v16 = vld [vmem:[%s2487_s5] ss:$0 sm:$0xff]  ;;  %v383_v36 = vld [vmem:[%s2486_s29 + $0x10] sm:$0xff]  ;;  %v382_v37 = vld [vmem:[%s2486_s29 + $0x8] sm:$0xff] }
  0x17   :  { %1661 = vmatprep.mubr.msk.f32.mxu0 %vm1819_vm0, %v1818_v0  ;;  %1685 = vmatpush3.msra.mxu0 %v293_v6  ;;  %v385_v31 = vld [vmem:[%s2486_s29 + $0x20] sm:$0xff]  ;;  %v488_v39 = vld [vmem:[%s2488_s25 + $0x38] sm:$0xff]  ;;  %v487_v40 = vld [vmem:[%s2488_s25 + $0x30] sm:$0xff] }
  0x18   :  { %1686 = vmatprep.subr.mxu0 %v1818_v0  ;;  %1672 = vmatpush3.msra.mxu1 %v190_v12  ;;  %v381_v38 = vld [vmem:[%s2486_s29] sm:$0xff]  ;;  %v486_v41 = vld [vmem:[%s2488_s25 + $0x28] sm:$0xff]  ;;  %v484_v43 = vld [vmem:[%s2488_s25 + $0x18] sm:$0xff]  ;;  %s2490_s29 = sld [smem:[#allocation10_spill]] }
  0x19   :  { %1687 = vmatpush3.msra.mxu0 %v292_v7  ;;  %1673 = vmatprep.subr.mxu1 %v1818_v0  ;;  %v485_v42 = vld [vmem:[%s2488_s25 + $0x20] sm:$0xff]  ;;  %v483_v44 = vld [vmem:[%s2488_s25 + $0x10] sm:$0xff]  ;;  %v482_v45 = vld [vmem:[%s2488_s25 + $0x8] sm:$0xff] }
  0x1a   :  { %1662 = vmatmul.mubr.msk.f32.gmra.mxu0 %vm90_vm1, %v78_v8  ;;  %1688 = vmatprep.subr.mxu0 %v1818_v0  ;;  %v481_v46 = vld [vmem:[%s2488_s25] sm:$0xff]  ;;  %s1821_s25 = smov 64  }
  0x1b   :  { %1664 = vmatprep.mubr.msk.f32.mxu0 %vm1819_vm0, %v1818_v0  ;;  %1689 = vmatpush3.msra.mxu0 %v291_v11  ;;  %v1512_v47 = vld [vmem:[%s2489_s9] ss:$0 sm:$0xff] }
  0x1c   :  { %1690 = vmatprep.subr.mxu0 %v1818_v0  ;;  %1674 = vmatpush3.msra.mxu1 %v189_v14 }
  0x1d   :  { %1691 = vmatpush3.msra.mxu0 %v290_v13  ;;  %422 = vmatprep.subr.mxu1 %v388_v15 }
  0x1e   :  { %1665 = vmatmul.mubr.msk.f32.gmra.mxu0 %vm90_vm1, %v79_v9  ;;  %525 = vmatprep.subr.mxu0 %v488_v39 }
  0x1f   :  { %1692 = vmatprep.mubr.msk.f32.mxu0 %vm1819_vm0, %v1818_v0 }
  0xd6   :  { %v166_v17 = vpop.f32.mrf.mxu0 }
  0xd7   :  { %v167_v18 = vadd.f32 %v1504_v16, %v166_v17 }
  0xd8   :  { %v1660_v19 = vpop.f32.mrf.mxu0 }
  0xd9   :  { %vm180_vm2 = vcmp.gt.f32.partialorder %v167_v18, 0.0  ;;  %v183_v20 = vmul.f32 0.01, %v167_v18 }
  0xda   :  { %v171_v21 = vpop.f32.mrf.mxu0 }
  0xdb   :  { %v172_v22 = vadd.f32 %v1504_v16, %v171_v21  ;;  %v186_v23 = vsel %vm180_vm2, %v167_v18, %v183_v20 }
  0xdc   :  { %v1663_v25 = vpop.f32.mrf.mxu0  ;;  %1676 = vmatmul.mubr.msk.f32.vlgmr.msra.gmra.mxu1 %vm200_vm3, %v186_v23  ;;  %1693 = vmatmul.mubr.msk.f32.vlgmr.msra.gmra.mxu0 %vm200_vm3, %v186_v23 }
  0xdd   :  { %vm181_vm4 = vcmp.gt.f32.partialorder %v172_v22, 0.0  ;;  %v184_v27 = vmul.f32 0.01, %v172_v22  ;;  %1678 = vmatprep.mubr.msk.f32.mxu1 %vm1819_vm0, %v1818_v0  ;;  %1695 = vmatprep.mubr.msk.f32.mxu0 %vm1819_vm0, %v1818_v0  ;;  %v794_v25 = vld [vmem:[%s2490_s29 + $0x78] sm:$0xff] }
  0xde   :  { %v176_v28 = vpop.f32.mrf.mxu0  ;;  %423 = vmatpush1.msra.mxu1 %v387_v24  ;;  %526 = vmatpush1.msra.mxu0 %v487_v40  ;;  %v810_v24 = vld [vmem:[%s2490_s29 + $0xf8] sm:$0xff] }
  0xdf   :  { %v177_v29 = vadd.f32 %v1504_v16, %v176_v28  ;;  %v187_v30 = vsel %vm181_vm4, %v172_v22, %v184_v27  ;;  %424 = vmatprep.subr.mxu1 %v386_v26  ;;  %527 = vmatprep.subr.mxu0 %v486_v41  ;;  %v809_v26 = vld [vmem:[%s2490_s29 + $0xf0] sm:$0xff]  ;;  %v808_v28 = vld [vmem:[%s2490_s29 + $0xe8] sm:$0xff]  ;;  %vm1495_vm4 = vcmask 130048  }
  0xe0   :  { %v1666_v32 = vpop.f32.mrf.mxu0  ;;  %1679 = vmatmul.mubr.msk.f32.gmra.mxu1 %vm200_vm3, %v187_v30  ;;  %1696 = vmatmul.mubr.msk.f32.gmra.mxu0 %vm200_vm3, %v187_v30  ;;  %v793_v27 = vld [vmem:[%s2490_s29 + $0x70] sm:$0xff]  ;;  %v807_v30 = vld [vmem:[%s2490_s29 + $0xe0] sm:$0xff] }
  0xe1   :  { %vm182_vm5 = vcmp.gt.f32.partialorder %v177_v29, 0.0  ;;  %v185_v34 = vmul.f32 0.01, %v177_v29  ;;  %1681 = vmatprep.mubr.msk.f32.mxu1 %vm1819_vm0, %v1818_v0  ;;  %1698 = vmatprep.mubr.msk.f32.mxu0 %vm1819_vm0, %v1818_v0  ;;  %v806_v32 = vld [vmem:[%s2490_s29 + $0xd8] sm:$0xff] }
  0xe2   :  { %425 = vmatpush1.msra.mxu1 %v385_v31  ;;  %528 = vmatpush1.msra.mxu0 %v485_v42  ;;  %v791_v31 = vld [vmem:[%s2490_s29 + $0x60] sm:$0xff] }
  0xe3   :  { %v188_v35 = vsel %vm182_vm5, %v177_v29, %v185_v34  ;;  %426 = vmatprep.subr.mxu1 %v384_v33  ;;  %529 = vmatprep.subr.mxu0 %v484_v43  ;;  %v792_v29 = vld [vmem:[%s2490_s29 + $0x68] sm:$0xff]  ;;  %v790_v33 = vld [vmem:[%s2490_s29 + $0x58] sm:$0xff]  ;;  %v805_v34 = vld [vmem:[%s2490_s29 + $0xd0] sm:$0xff]  ;;  %vm1498_vm5 = vcmask 125952  }
  0xe4   :  { %1682 = vmatmul.mubr.msk.f32.gmra.mxu1 %vm200_vm3, %v188_v35  ;;  %1699 = vmatmul.mubr.msk.f32.gmra.mxu0 %vm200_vm3, %v188_v35  ;;  %v789_v35 = vld [vmem:[%s2490_s29 + $0x50] sm:$0xff] }
  0xe5   :  { %462 = vmatprep.mubr.f32.mxu1 %v1818_v0  ;;  %565 = vmatprep.mubr.f32.mxu0 %v1818_v0 }
  0xe6   :  { %427 = vmatpush1.msra.mxu1 %v383_v36  ;;  %530 = vmatpush1.msra.mxu0 %v483_v44  ;;  %v804_v36 = vld [vmem:[%s2490_s29 + $0xc8] sm:$0xff] }
  0xe7   :  { %428 = vmatprep.subr.mxu1 %v382_v37  ;;  %531 = vmatprep.subr.mxu0 %v482_v45  ;;  %v788_v37 = vld [vmem:[%s2490_s29 + $0x48] sm:$0xff] }
  0xe8   :  { %429 = vmatpush1.msra.mxu1 %v381_v38  ;;  %532 = vmatpush1.msra.mxu0 %v481_v46  ;;  %v803_v38 = vld [vmem:[%s2490_s29 + $0xc0] sm:$0xff] }
  0xe9   :  { %699 = vmatprep.subr.mxu1 %v488_v39  ;;  %1572 = vmatprep.subr.mxu0 %v810_v24  ;;  %v787_v39 = vld [vmem:[%s2490_s29 + $0x40] sm:$0xff] }
 0x19c   :  { %v2083_v48 = vpop.f32.mrf.mxu1  ;;  %v367_v49 = vpop.f32.mrf.mxu0 }
 0x19d   :  { %v368_v50 = vadd.f32 %v1512_v47, %v367_v49  ;;  %v798_v49 = vld [vmem:[%s2490_s29 + $0x98] sm:$0xff] }
 0x19e   :  { %v1677_v51 = vpop.f32.mrf.mxu1  ;;  %v1694_v52 = vpop.f32.mrf.mxu0 }
 0x19f   :  { %489 = vrot.lane.b32.xlu0 %v368_v50, %s1820_s26  ;;  %1516 = vmatmul.mubr.msk.f32.vlgmr.msra.gmra.mxu1 %vm200_vm3, %v368_v50  ;;  %v797_v51 = vld [vmem:[%s2490_s29 + $0x90] sm:$0xff] }
 0x1a0   :  { %v2086_v53 = vpop.f32.mrf.mxu1  ;;  %v372_v54 = vpop.f32.mrf.mxu0  ;;  %468 = vmatprep.mubr.f32.mxu1 %v1818_v0  ;;  %700 = vmatpush1.msra.mxu1 %v487_v40  ;;  %v802_v40 = vld [vmem:[%s2490_s29 + $0xb8] sm:$0xff]  ;;  %v781_v52 = vld [vmem:[%s2490_s29 + $0x10] sm:$0xff] }
 0x1a1   :  { %v373_v55 = vadd.f32 %v1512_v47, %v372_v54  ;;  %701 = vmatprep.subr.mxu1 %v486_v41  ;;  %v786_v41 = vld [vmem:[%s2490_s29 + $0x38] sm:$0xff] }
 0x1a2   :  { %v1680_v56 = vpop.f32.mrf.mxu1  ;;  %v1697_v57 = vpop.f32.mrf.mxu0  ;;  %702 = vmatpush1.msra.mxu1 %v485_v42  ;;  %v801_v42 = vld [vmem:[%s2490_s29 + $0xb0] sm:$0xff] }
 0x1a3   :  { %491 = vrot.lane.b32.xlu0 %v373_v55, %s1820_s26  ;;  %1517 = vmatmul.mubr.msk.f32.gmra.mxu1 %vm200_vm3, %v373_v55 }
 0x1a4   :  { %v2090_v58 = vpop.f32.mrf.mxu1  ;;  %v377_v59 = vpop.f32.mrf.mxu0  ;;  %474 = vmatprep.mubr.f32.mxu1 %v1818_v0  ;;  %703 = vmatprep.subr.mxu1 %v484_v43  ;;  %v785_v43 = vld [vmem:[%s2490_s29 + $0x30] sm:$0xff] }
 0x1a5   :  { %v378_v60 = vadd.f32 %v1512_v47, %v377_v59  ;;  %704 = vmatpush1.msra.mxu1 %v483_v44  ;;  %v800_v44 = vld [vmem:[%s2490_s29 + $0xa8] sm:$0xff]  ;;  %v783_v47 = vld [vmem:[%s2490_s29 + $0x20] sm:$0xff] }
 0x1a6   :  { %v1683_v61 = vpop.f32.mrf.mxu1  ;;  %v1700_v62 = vpop.f32.mrf.mxu0  ;;  %705 = vmatprep.subr.mxu1 %v482_v45  ;;  %v784_v45 = vld [vmem:[%s2490_s29 + $0x28] sm:$0xff] }
 0x1a7   :  { %665 = vrot.lane.b32.xlu0 %v373_v55, %s1821_s25  ;;  %493 = vrot.lane.b32.xlu1 %v378_v60, %s1820_s26 }
 0x1a8   :  { %1518 = vmatmul.mubr.msk.f32.gmra.mxu1 %vm200_vm3, %v378_v60 }
 0x1a9   :  { %706 = vmatpush1.msra.mxu1 %v481_v46  ;;  %739 = vmatprep.mubr.f32.mxu1 %v1818_v0  ;;  %v799_v46 = vld [vmem:[%s2490_s29 + $0xa0] sm:$0xff] }
 0x1aa   :  { %1701 = vmatprep.subr.mxu1 %v1818_v0 }
 0x1ab   :  { %663 = vrot.lane.b32.xlu1 %v368_v50, %s1821_s25  ;;  %v782_v50 = vld [vmem:[%s2490_s29 + $0x18] sm:$0xff] }
 0x1af   :  { %667 = vrot.lane.b32.xlu1 %v378_v60, %s1821_s25 }
 0x211   :  { %v490_v63 = vpop.permute.xlu0 %489 }
 0x212   :  { %1519 = vmatmul.mubr.msk.f32.vlgmr.msra.gmra.mxu0 %vm200_vm3, %v490_v63 }
 0x213   :  { %571 = vmatprep.mubr.f32.mxu0 %v1818_v0  ;;  %1573 = vmatpush3.msra.mxu0 %v794_v25 }
 0x214   :  { %1574 = vmatprep.subr.mxu0 %v809_v26 }
 0x215   :  { %v492_v1 = vpop.permute.xlu0 %491  ;;  %1575 = vmatpush3.msra.mxu0 %v793_v27 }
 0x216   :  { %1520 = vmatmul.mubr.msk.f32.gmra.mxu0 %vm200_vm3, %v492_v1  ;;  %1576 = vmatprep.subr.mxu0 %v808_v28 }
 0x217   :  { %577 = vmatprep.mubr.f32.mxu0 %v1818_v0  ;;  %1577 = vmatpush3.msra.mxu0 %v792_v29 }
 0x218   :  { %1578 = vmatprep.subr.mxu0 %v807_v30 }
 0x219   :  { %v494_v2 = vpop.permute.xlu1 %493  ;;  %v666_v4 = vpop.permute.xlu0 %665  ;;  %1579 = vmatpush3.msra.mxu0 %v791_v31 }
 0x21a   :  { %1521 = vmatmul.mubr.msk.f32.gmra.mxu0 %vm200_vm3, %v494_v2  ;;  %1580 = vmatprep.subr.mxu0 %v806_v32 }
 0x21b   :  { %1581 = vmatpush3.msra.mxu0 %v790_v33 }
 0x21c   :  { %1582 = vmatprep.subr.mxu0 %v805_v34 }
 0x21d   :  { %v664_v3 = vpop.permute.xlu1 %663  ;;  %1583 = vmatpush3.msra.mxu0 %v789_v35 }
 0x21e   :  { %1522 = vmatmul.mubr.msk.f32.vlgmr.msra.gmra.mxu1 %vm200_vm3, %v664_v3  ;;  %1584 = vmatprep.subr.mxu0 %v804_v36 }
 0x21f   :  { %745 = vmatprep.mubr.f32.mxu1 %v1818_v0  ;;  %1585 = vmatpush3.msra.mxu0 %v788_v37 }
 0x220   :  { %1586 = vmatprep.subr.mxu0 %v803_v38 }
 0x221   :  { %v668_v5 = vpop.permute.xlu1 %667  ;;  %1587 = vmatpush3.msra.mxu0 %v787_v39 }
 0x222   :  { %1523 = vmatmul.mubr.msk.f32.gmra.mxu1 %vm200_vm3, %v666_v4  ;;  %1588 = vmatprep.subr.mxu0 %v802_v40 }
 0x223   :  { %751 = vmatprep.mubr.f32.mxu1 %v1818_v0  ;;  %1589 = vmatpush3.msra.mxu0 %v786_v41  ;;  %v796_v41 = vld [vmem:[%s2490_s29 + $0x88] sm:$0xff] }
 0x224   :  { %1590 = vmatprep.subr.mxu0 %v801_v42  ;;  %v780_v42 = vld [vmem:[%s2490_s29 + $0x8] sm:$0xff] }
 0x225   :  { %1591 = vmatpush3.msra.mxu0 %v785_v43  ;;  %v795_v43 = vld [vmem:[%s2490_s29 + $0x80] sm:$0xff] }
 0x226   :  { %1524 = vmatmul.mubr.msk.f32.gmra.mxu1 %vm200_vm3, %v668_v5  ;;  %1592 = vmatprep.subr.mxu0 %v800_v44  ;;  %v779_v44 = vld [vmem:[%s2490_s29] sm:$0xff] }
 0x227   :  { %1709 = vmatprep.mubr.msk.f32.mxu1 %vm1819_vm0, %v1818_v0  ;;  %1593 = vmatpush3.msra.mxu0 %v784_v45 }
 0x228   :  { %1594 = vmatprep.subr.mxu0 %v799_v46 }
 0x229   :  { %1595 = vmatpush3.msra.mxu0 %v783_v47 }
 0x22a   :  { %1596 = vmatprep.subr.mxu0 %v798_v49  ;;  %v894_v49 = vld [vmem:[%s2450_s10 + $0x18] sm:$0xff] }
 0x22b   :  { %1597 = vmatpush3.msra.mxu0 %v782_v50  ;;  %v893_v50 = vld [vmem:[%s2450_s10 + $0x10] sm:$0xff]  ;;  %1702 = vmatpush3.msra.mxu1 %v894_v49  ;;  %v1142_v49 = vld [vmem:[%s2453_s16 + $0x8] sm:$0xff] }
 0x22c   :  { %1598 = vmatprep.subr.mxu0 %v797_v51  ;;  %1703 = vmatprep.subr.mxu1 %v1818_v0 }
 0x22d   :  { %1599 = vmatpush3.msra.mxu0 %v781_v52  ;;  %v892_v52 = vld [vmem:[%s2450_s10 + $0x8] sm:$0xff]  ;;  %1704 = vmatpush3.msra.mxu1 %v893_v50  ;;  %v1141_v50 = vld [vmem:[%s2453_s16] sm:$0xff] }
 0x22e   :  { %1600 = vmatprep.subr.mxu0 %v796_v41  ;;  %1705 = vmatprep.subr.mxu1 %v1818_v0 }
 0x22f   :  { %1601 = vmatpush3.msra.mxu0 %v780_v42  ;;  %1706 = vmatpush3.msra.mxu1 %v892_v52  ;;  %v1256_v52 = vld [vmem:[%s2454_s18 + $0x30] sm:$0xff] }
 0x230   :  { %1602 = vmatprep.subr.mxu0 %v795_v43  ;;  %1707 = vmatprep.subr.mxu1 %v1818_v0 }
 0x231   :  { %1603 = vmatpush3.msra.mxu0 %v779_v44 }
 0x232   :  { %1752 = vmatprep.subr.mxu0 %v1818_v0 }
 0x25f   :  { %v464_v6 = vpop.f32.mrf.mxu1 }
 0x261   :  { %v466_v7 = vpop.f32.mrf.mxu1 }
 0x263   :  { %v470_v8 = vpop.f32.mrf.mxu1 }
 0x265   :  { %v472_v12 = vpop.f32.mrf.mxu1 }
 0x268   :  { %v476_v16 = vpop.f32.mrf.mxu1 }
 0x26a   :  { %v478_v21 = vpop.f32.mrf.mxu1 }
 0x2d2   :  { %v567_v9 = vpop.f32.mrf.mxu0 }
 0x2d3   :  { %v2111_v10 = vmul.f32 %v567_v9, %v464_v6 }
 0x2d4   :  { %v569_v11 = vpop.f32.mrf.mxu0 }
 0x2d5   :  { %593 = vrot.lane.b32.xlu0 %v2111_v10, %s1821_s25  ;;  %v2119_v18 = vmul.f32 %v569_v11, %v466_v7 }
 0x2d6   :  { %v573_v13 = vpop.f32.mrf.mxu0 }
 0x2d7   :  { %v2115_v14 = vmul.f32 %v573_v13, %v470_v8 }
 0x2d8   :  { %v575_v15 = vpop.f32.mrf.mxu0 }
 0x2d9   :  { %595 = vrot.lane.b32.xlu1 %v2115_v14, %s1821_s25  ;;  %v2127_v22 = vmul.f32 %v575_v15, %v472_v12 }
 0x2da   :  { %v579_v17 = vpop.f32.mrf.mxu0 }
 0x2db   :  { %v2121_v19 = vmul.f32 %v579_v17, %v476_v16 }
 0x2dc   :  { %v581_v20 = vpop.f32.mrf.mxu0 }
 0x2dd   :  { %611 = vrot.lane.b32.xlu1 %v2119_v18, %s1821_s25  ;;  %597 = vrot.lane.b32.xlu0 %v2121_v19, %s1821_s25  ;;  %v2129_v23 = vmul.f32 %v581_v20, %v478_v21 }
 0x2e1   :  { %613 = vrot.lane.b32.xlu0 %v2127_v22, %s1821_s25  ;;  %615 = vrot.lane.b32.xlu1 %v2129_v23, %s1821_s25 }
 0x347   :  { %v594_v54 = vpop.permute.xlu0 %593 }
 0x348   :  { %v602_v55 = vadd.f32 %v594_v54, %v2111_v10  ;;  %v741_v54 = vpop.f32.mrf.mxu1 }
 0x34a   :  { %v605_v59 = vadd.f32 %v602_v55, %v2119_v18  ;;  %v743_v55 = vpop.f32.mrf.mxu1 }
 0x34b   :  { %v596_v56 = vpop.permute.xlu1 %595 }
 0x34c   :  { %v603_v57 = vadd.f32 %v596_v56, %v2115_v14  ;;  %v747_v56 = vpop.f32.mrf.mxu1 }
 0x34e   :  { %v606_v1 = vadd.f32 %v603_v57, %v2127_v22  ;;  %v749_v57 = vpop.f32.mrf.mxu1 }
 0x34f   :  { %v612_v60 = vpop.permute.xlu1 %611  ;;  %v598_v61 = vpop.permute.xlu0 %597 }
 0x350   :  { %v620_v62 = vadd.f32 %v612_v60, %v605_v59  ;;  %v604_v63 = vadd.f32 %v598_v61, %v2121_v19 }
 0x352   :  { %v607_v2 = vadd.f32 %v604_v63, %v2129_v23  ;;  %v623_v5 = vmul.f32 0.35355338, %v620_v62 }
 0x353   :  { %v614_v3 = vpop.permute.xlu0 %613  ;;  %v616_v4 = vpop.permute.xlu1 %615 }
 0x354   :  { %v621_v6 = vadd.f32 %v614_v3, %v606_v1  ;;  %v622_v7 = vadd.f32 %v616_v4, %v607_v2  ;;  %v627_v10 = vsel %vm626_vm6, %v623_v5, -inf  ;;  %v753_v2 = vpop.f32.mrf.mxu1 }
 0x356   :  { %v624_v8 = vmul.f32 0.35355338, %v621_v6  ;;  %v625_v9 = vmul.f32 0.35355338, %v622_v7  ;;  %v755_v6 = vpop.f32.mrf.mxu1 }
 0x358   :  { %v628_v11 = vsel %vm626_vm6, %v624_v8, -inf  ;;  %v630_v13 = vsel %vm629_vm7, %v625_v9, -inf }
 0x359   :  { %v631_v12 = vmax.f32 %v627_v10, %v628_v11  ;;  %v891_v10 = vld [vmem:[%s2450_s10] sm:$0xff] }
 0x35a   :  { %1708 = vmatpush3.msra.mxu1 %v891_v10 }
 0x35b   :  { %v632_v14 = vmax.f32 %v631_v12, %v630_v13  ;;  %1718 = vmatprep.subr.mxu1 %v1818_v0 }
 0x35d   :  { %v633_v15 = vrot.slane %v632_v14, 4 }
 0x35f   :  { %v634_v16 = vmax.f32 %v632_v14, %v633_v15 }
 0x361   :  { %v635_v17 = vrot.slane %v634_v16, 2 }
 0x363   :  { %v636_v18 = vmax.f32 %v634_v16, %v635_v17 }
 0x365   :  { %v637_v19 = vrot.slane %v636_v18, 1 }
 0x367   :  { %v638_v20 = vmax.f32 %v636_v18, %v637_v19 }
 0x369   :  { %v639_v21 = vsub.f32 %v623_v5, %v638_v20  ;;  %v640_v22 = vsub.f32 %v624_v8, %v638_v20  ;;  %v641_v23 = vsub.f32 %v625_v9, %v638_v20  ;;  %v1012_v20 = vld [vmem:[%s2451_s12 + $0x18] sm:$0xff] }
 0x36b   :  { %v642_v24 = vmul.f32 1.442695, %v639_v21  ;;  %v644_v25 = vmul.f32 1.442695, %v640_v22  ;;  %v646_v26 = vmul.f32 1.442695, %v641_v23 }
 0x36c   :  { %v1011_v21 = vld [vmem:[%s2451_s12 + $0x10] sm:$0xff]  ;;  %v1010_v22 = vld [vmem:[%s2451_s12 + $0x8] sm:$0xff]  ;;  %v1009_v23 = vld [vmem:[%s2451_s12] sm:$0xff] }
 0x36d   :  { %1798 = vpow2.f32 %v642_v24  ;;  %v1525_v24 = vld [vmem:[%s2452_s11] ss:$0 sm:$0xff] }
 0x36e   :  { %1800 = vpow2.f32 %v644_v25 }
 0x36f   :  { %1802 = vpow2.f32 %v646_v26 }
 0x37a   :  { %v1799_v27 = vpop.eup %1798 }
 0x37b   :  { %v1801_v28 = vpop.eup %1800  ;;  %v648_v29 = vsel %vm626_vm6, %v1799_v27, 0.0 }
 0x37c   :  { %v1803_v30 = vpop.eup %1802  ;;  %v649_v31 = vsel %vm626_vm6, %v1801_v28, 0.0 }
 0x37d   :  { %v650_v32 = vadd.f32 %v649_v31, %v648_v29  ;;  %v651_v33 = vsel %vm629_vm7, %v1803_v30, 0.0 }
 0x37f   :  { %v652_v34 = vadd.f32 %v651_v33, %v650_v32 }
 0x381   :  { %v653_v35 = vrot.slane %v652_v34, 4 }
 0x383   :  { %v654_v36 = vadd.f32 %v653_v35, %v652_v34 }
 0x385   :  { %v655_v37 = vrot.slane %v654_v36, 2 }
 0x387   :  { %v656_v38 = vadd.f32 %v655_v37, %v654_v36 }
 0x389   :  { %v657_v39 = vrot.slane %v656_v38, 1 }
 0x38b   :  { %v658_v40 = vadd.f32 %v657_v39, %v656_v38 }
 0x38d   :  { %1804 = vrcp.f32 %v658_v40 }
 0x39a   :  { %v1805_v45 = vpop.eup %1804 }
 0x39b   :  { %v661_v46 = vmul.f32 %v1805_v45, %v1801_v28  ;;  %v660_v47 = vmul.f32 %v1805_v45, %v1799_v27  ;;  %v662_v51 = vmul.f32 %v1805_v45, %v1803_v30 }
 0x39d   :  { %763 = vrot.lane.b32.xlu1 %v661_v46, %s1821_s25  ;;  %761 = vrot.lane.b32.xlu0 %v660_v47, %s1821_s25 }
 0x3a1   :  { %765 = vrot.lane.b32.xlu0 %v662_v51, %s1821_s25 }
 0x40f   :  { %v764_v59 = vpop.permute.xlu1 %763  ;;  %v762_v60 = vpop.permute.xlu0 %761 }
 0x410   :  { %v771_v61 = vsel %vm626_vm6, %v661_v46, %v764_v59  ;;  %v770_v62 = vsel %vm626_vm6, %v660_v47, %v762_v60  ;;  %v1144_v46 = vld [vmem:[%s2453_s16 + $0x18] sm:$0xff]  ;;  %v1143_v47 = vld [vmem:[%s2453_s16 + $0x10] sm:$0xff]  ;;  %v1508_v60 = vld [vmem:[%s2456_s4] ss:$0 sm:$0xff] }
 0x411   :  { %v773_v63 = vmul.f32 %v770_v62, %v741_v54  ;;  %v774_v1 = vmul.f32 %v770_v62, %v743_v55  ;;  %v776_v3 = vmul.f32 %v771_v61, %v749_v57  ;;  %v775_v7 = vmul.f32 %v771_v61, %v747_v56  ;;  %v1255_v54 = vld [vmem:[%s2454_s18 + $0x28] sm:$0xff]  ;;  %v1254_v55 = vld [vmem:[%s2454_s18 + $0x20] sm:$0xff]  ;;  %v1253_v56 = vld [vmem:[%s2454_s18 + $0x18] sm:$0xff] }
 0x412   :  { %v1532_v57 = vld [vmem:[%s2455_s13] ss:$0 sm:$0xff]  ;;  %v282_v10 = vadd.f32 %v1508_v60, %v2086_v53 }
 0x413   :  { %875 = vmatprep.mubr.f32.mxu0 %v774_v1  ;;  %v766_v4 = vpop.permute.xlu0 %765  ;;  %v277_v1 = vadd.f32 %v1508_v60, %v2083_v48 }
 0x414   :  { %v772_v5 = vsel %vm626_vm6, %v662_v51, %v766_v4  ;;  %876 = vmatmul.mubr.f32.vlgmr.msra.gmra.mxu0 %v773_v63  ;;  %v1257_v51 = vld [vmem:[%s2454_s18 + $0x38] sm:$0xff]  ;;  %v1536_v4 = vld [vmem:[%s2457_s14] ss:$0 sm:$0xff] }
 0x415   :  { %880 = vmatprep.mubr.f32.mxu0 %v776_v3  ;;  %v778_v8 = vmul.f32 %v772_v5, %v755_v6  ;;  %v777_v9 = vmul.f32 %v772_v5, %v753_v2  ;;  %1753 = vmatpush3.msra.mxu0 %v1257_v51 }
 0x416   :  { %1754 = vmatprep.subr.mxu0 %v1818_v0 }
 0x417   :  { %1755 = vmatpush3.msra.mxu0 %v1256_v52 }
 0x418   :  { %881 = vmatmul.mubr.f32.gmra.mxu0 %v775_v7  ;;  %1756 = vmatprep.subr.mxu0 %v1818_v0 }
 0x419   :  { %885 = vmatprep.mubr.f32.mxu0 %v778_v8  ;;  %1757 = vmatpush3.msra.mxu0 %v1255_v54  ;;  %v1537_v8 = vld [vmem:[%s2458_s15] ss:$0 sm:$0xff] }
 0x41a   :  { %1758 = vmatprep.subr.mxu0 %v1818_v0 }
 0x41b   :  { %1759 = vmatpush3.msra.mxu0 %v1254_v55  ;;  %v1546_v55 = vld [vmem:[%s2462_s20] ss:$0 sm:$0xff] }
 0x41c   :  { %886 = vmatmul.mubr.f32.gmra.mxu0 %v777_v9  ;;  %1760 = vmatprep.subr.mxu0 %v1818_v0 }
 0x41d   :  { %1768 = vmatprep.mubr.msk.f32.mxu0 %vm1819_vm0, %v1818_v0  ;;  %1761 = vmatpush3.msra.mxu0 %v1253_v56 }
 0x41e   :  { %1762 = vmatprep.subr.mxu0 %v1818_v0 }
 0x4d4   :  { %v1604_v11 = vpop.f32.mrf.mxu0 }
 0x4d6   :  { %v1605_v12 = vpop.f32.mrf.mxu0 }
 0x4d7   :  { %v1606_v13 = vadd.f32 %v1605_v12, %v1604_v11 }
 0x4d8   :  { %v1607_v14 = vpop.f32.mrf.mxu0 }
 0x4d9   :  { %1710 = vmatmul.mubr.msk.f32.vlgmr.msra.gmra.mxu1 %vm200_vm3, %v1606_v13 }
 0x4da   :  { %v1608_v15 = vpop.f32.mrf.mxu0  ;;  %1712 = vmatprep.mubr.msk.f32.mxu1 %vm1819_vm0, %v1818_v0  ;;  %1719 = vmatpush3.msra.mxu1 %v1012_v20 }
 0x4db   :  { %v1609_v16 = vadd.f32 %v1608_v15, %v1607_v14  ;;  %1720 = vmatprep.subr.mxu1 %v1818_v0 }
 0x4dc   :  { %v1610_v17 = vpop.f32.mrf.mxu0  ;;  %1721 = vmatpush3.msra.mxu1 %v1011_v21 }
 0x4dd   :  { %1713 = vmatmul.mubr.msk.f32.gmra.mxu1 %vm200_vm3, %v1609_v16  ;;  %1722 = vmatprep.subr.mxu1 %v1818_v0 }
 0x4de   :  { %v1611_v18 = vpop.f32.mrf.mxu0  ;;  %1715 = vmatprep.mubr.msk.f32.mxu1 %vm1819_vm0, %v1818_v0  ;;  %1723 = vmatpush3.msra.mxu1 %v1010_v22 }
 0x4df   :  { %v1612_v19 = vadd.f32 %v1611_v18, %v1610_v17  ;;  %1724 = vmatprep.subr.mxu1 %v1818_v0  ;;  %v287_v18 = vadd.f32 %v1508_v60, %v2090_v58  ;;  %v1252_v58 = vld [vmem:[%s2454_s18 + $0x10] sm:$0xff]  ;;  %v1547_v60 = vld [vmem:[%s2463_s21] ss:$0 sm:$0xff] }
 0x4e0   :  { %1725 = vmatpush3.msra.mxu1 %v1009_v23  ;;  %1763 = vmatpush3.msra.mxu0 %v1252_v58 }
 0x4e1   :  { %1716 = vmatmul.mubr.msk.f32.gmra.mxu1 %vm200_vm3, %v1612_v19  ;;  %1735 = vmatprep.subr.mxu1 %v1818_v0 }
 0x4e2   :  { %1726 = vmatprep.mubr.msk.f32.mxu1 %vm1819_vm0, %v1818_v0  ;;  %1764 = vmatprep.subr.mxu0 %v1818_v0 }
 0x599   :  { %v977_v25 = vpop.f32.mrf.mxu1 }
 0x59a   :  { %v978_v26 = vadd.f32 %v1525_v24, %v977_v25  ;;  %v1250_v25 = vld [vmem:[%s2454_s18] sm:$0xff] }
 0x59b   :  { %v1711_v27 = vpop.f32.mrf.mxu1 }
 0x59c   :  { %v1529_v28 = vmul.f32 -1.442695, %v978_v26  ;;  %v1538_v26 = vld [vmem:[%s2459_s17] ss:$0 sm:$0xff] }
 0x59d   :  { %v982_v29 = vpop.f32.mrf.mxu1 }
 0x59e   :  { %1806 = vpow2.f32 %v1529_v28  ;;  %v983_v30 = vadd.f32 %v1525_v24, %v982_v29 }
 0x59f   :  { %v1714_v31 = vpop.f32.mrf.mxu1 }
 0x5a0   :  { %v1530_v32 = vmul.f32 -1.442695, %v983_v30 }
 0x5a1   :  { %v987_v33 = vpop.f32.mrf.mxu1 }
 0x5a2   :  { %1808 = vpow2.f32 %v1530_v32  ;;  %v988_v34 = vadd.f32 %v1525_v24, %v987_v33  ;;  %v1251_v24 = vld [vmem:[%s2454_s18 + $0x8] sm:$0xff] }
 0x5a3   :  { %v1717_v35 = vpop.f32.mrf.mxu1  ;;  %1765 = vmatpush3.msra.mxu0 %v1251_v24 }
 0x5a4   :  { %v1531_v36 = vmul.f32 -1.442695, %v988_v34  ;;  %1766 = vmatprep.subr.mxu0 %v1818_v0 }
 0x5a5   :  { %1767 = vmatpush3.msra.mxu0 %v1250_v25 }
 0x5a6   :  { %1810 = vpow2.f32 %v1531_v36 }
 0x5ab   :  { %v1807_v37 = vpop.eup %1806 }
 0x5ac   :  { %v1000_v38 = vadd.f32 1.0, %v1807_v37 }
 0x5ae   :  { %1812 = vrcp.f32 %v1000_v38 }
 0x5af   :  { %v1809_v39 = vpop.eup %1808 }
 0x5b0   :  { %v1001_v40 = vadd.f32 1.0, %v1809_v39 }
 0x5b2   :  { %1814 = vrcp.f32 %v1001_v40 }
 0x5b3   :  { %v1811_v41 = vpop.eup %1810 }
 0x5b4   :  { %v1002_v42 = vadd.f32 1.0, %v1811_v41 }
 0x5b6   :  { %1816 = vrcp.f32 %v1002_v42  ;;  %v1389_v42 = vld [vmem:[%s2460_s22 + $0x18] sm:$0xff] }
 0x5bb   :  { %v1813_v43 = vpop.eup %1812 }
 0x5bc   :  { %1727 = vmatmul.mubr.msk.f32.vlgmr.msra.gmra.mxu1 %vm200_vm3, %v1813_v43  ;;  %v1388_v43 = vld [vmem:[%s2460_s22 + $0x10] sm:$0xff] }
 0x5bd   :  { %1729 = vmatprep.mubr.msk.f32.mxu1 %vm1819_vm0, %v1818_v0  ;;  %1736 = vmatpush3.msra.mxu1 %v1144_v46  ;;  %v1542_v46 = vld [vmem:[%s2461_s19] ss:$0 sm:$0xff] }
 0x5be   :  { %1737 = vmatprep.subr.mxu1 %v1818_v0 }
 0x5bf   :  { %v1815_v44 = vpop.eup %1814  ;;  %1738 = vmatpush3.msra.mxu1 %v1143_v47 }
 0x5c0   :  { %1730 = vmatmul.mubr.msk.f32.gmra.mxu1 %vm200_vm3, %v1815_v44  ;;  %1739 = vmatprep.subr.mxu1 %v1818_v0  ;;  %v1387_v44 = vld [vmem:[%s2460_s22 + $0x8] sm:$0xff] }
 0x5c1   :  { %1732 = vmatprep.mubr.msk.f32.mxu1 %vm1819_vm0, %v1818_v0  ;;  %1740 = vmatpush3.msra.mxu1 %v1142_v49 }
 0x5c2   :  { %1741 = vmatprep.subr.mxu1 %v1818_v0 }
 0x5c3   :  { %v1817_v45 = vpop.eup %1816  ;;  %1742 = vmatpush3.msra.mxu1 %v1141_v50 }
 0x5c4   :  { %1733 = vmatmul.mubr.msk.f32.gmra.mxu1 %vm200_vm3, %v1817_v45  ;;  %1777 = vmatprep.subr.mxu1 %v1818_v0  ;;  %v1386_v45 = vld [vmem:[%s2460_s22] sm:$0xff] }
 0x5c5   :  { %1743 = vmatprep.mubr.msk.f32.mxu1 %vm1819_vm0, %v1818_v0 }
 0x67c   :  { %v1095_v59 = vpop.f32.mrf.mxu1 }
 0x67d   :  { %v1096_v61 = vadd.f32 %v1532_v57, %v1095_v59 }
 0x67e   :  { %v1728_v62 = vpop.f32.mrf.mxu1 }
 0x67f   :  { %vm1109_vm8 = vcmp.gt.f32.partialorder %v1096_v61, 0.0  ;;  %v1112_v63 = vmul.f32 0.01, %v1096_v61 }
 0x680   :  { %v1100_v2 = vpop.f32.mrf.mxu1 }
 0x681   :  { %v1115_v3 = vsel %vm1109_vm8, %v1096_v61, %v1112_v63  ;;  %v1101_v5 = vadd.f32 %v1532_v57, %v1100_v2 }
 0x682   :  { %v1118_v6 = vadd.f32 %v1115_v3, %v277_v1  ;;  %v1731_v7 = vpop.f32.mrf.mxu1 }
 0x683   :  { %vm1110_vm9 = vcmp.gt.f32.partialorder %v1101_v5, 0.0  ;;  %v1113_v9 = vmul.f32 0.01, %v1101_v5 }
 0x684   :  { %v1128_v11 = vmul.f32 %v1536_v4, %v1118_v6  ;;  %v1105_v12 = vpop.f32.mrf.mxu1 }
 0x685   :  { %v1116_v48 = vsel %vm1110_vm9, %v1101_v5, %v1113_v9  ;;  %v1106_v13 = vadd.f32 %v1532_v57, %v1105_v12 }
 0x686   :  { %v2355_v14 = vadd.f32 %v1537_v8, %v1128_v11  ;;  %v1119_v15 = vadd.f32 %v1116_v48, %v282_v10  ;;  %v1734_v16 = vpop.f32.mrf.mxu1  ;;  %v1548_v48 = vld [vmem:[%s2464_s23] ss:$0 sm:$0xff] }
 0x687   :  { %vm1111_vm10 = vcmp.gt.f32.partialorder %v1106_v13, 0.0  ;;  %v1114_v17 = vmul.f32 0.01, %v1106_v13 }
 0x688   :  { %v1129_v19 = vmul.f32 %v1536_v4, %v1119_v15  ;;  %1744 = vmatmul.mubr.msk.f32.vlgmr.msra.gmra.mxu1 %vm200_vm3, %v2355_v14 }
 0x689   :  { %v1117_v20 = vsel %vm1111_vm10, %v1106_v13, %v1114_v17  ;;  %1746 = vmatprep.mubr.msk.f32.mxu1 %vm1819_vm0, %v1818_v0  ;;  %1778 = vmatpush3.msra.mxu1 %v1389_v42 }
 0x68a   :  { %v1120_v53 = vadd.f32 %v1117_v20, %v287_v18  ;;  %v2362_v21 = vadd.f32 %v1537_v8, %v1129_v19  ;;  %1779 = vmatprep.subr.mxu1 %v1818_v0 }
 0x68b   :  { %1780 = vmatpush3.msra.mxu1 %v1388_v43 }
 0x68c   :  { %v1130_v22 = vmul.f32 %v1536_v4, %v1120_v53  ;;  %1747 = vmatmul.mubr.msk.f32.gmra.mxu1 %vm200_vm3, %v2362_v21  ;;  %1781 = vmatprep.subr.mxu1 %v1818_v0 }
 0x68d   :  { %1749 = vmatprep.mubr.msk.f32.mxu1 %vm1819_vm0, %v1818_v0  ;;  %1782 = vmatpush3.msra.mxu1 %v1387_v44 }
 0x68e   :  { %v2368_v23 = vadd.f32 %v1537_v8, %v1130_v22  ;;  %1783 = vmatprep.subr.mxu1 %v1818_v0 }
 0x68f   :  { %1784 = vmatpush3.msra.mxu1 %v1386_v45 }
 0x690   :  { %1750 = vmatmul.mubr.msk.f32.gmra.mxu1 %vm200_vm3, %v2368_v23 }
 0x691   :  { %1785 = vmatprep.mubr.msk.f32.mxu1 %vm1819_vm0, %v1818_v0 }
 0x748   :  { %v1227_v27 = vpop.f32.mrf.mxu1 }
 0x749   :  { %v1228_v28 = vadd.f32 %v1538_v26, %v1227_v27 }
 0x74a   :  { %v1745_v29 = vpop.f32.mrf.mxu1 }
 0x74b   :  { %vm1241_vm11 = vcmp.gt.f32.partialorder %v1228_v28, 0.0  ;;  %v1244_v30 = vmul.f32 0.01, %v1228_v28 }
 0x74c   :  { %v1232_v31 = vpop.f32.mrf.mxu1 }
 0x74d   :  { %v1247_v32 = vsel %vm1241_vm11, %v1228_v28, %v1244_v30  ;;  %v1233_v33 = vadd.f32 %v1538_v26, %v1232_v31 }
 0x74e   :  { %v1748_v34 = vpop.f32.mrf.mxu1  ;;  %1769 = vmatmul.mubr.msk.f32.vlgmr.msra.gmra.mxu0 %vm626_vm6, %v1247_v32 }
 0x74f   :  { %vm1242_vm12 = vcmp.gt.f32.partialorder %v1233_v33, 0.0  ;;  %v1245_v35 = vmul.f32 0.01, %v1233_v33  ;;  %1771 = vmatprep.mubr.msk.f32.mxu0 %vm1819_vm0, %v1818_v0 }
 0x750   :  { %v1237_v36 = vpop.f32.mrf.mxu1 }
 0x751   :  { %v1238_v37 = vadd.f32 %v1538_v26, %v1237_v36  ;;  %v1248_v38 = vsel %vm1242_vm12, %v1233_v33, %v1245_v35 }
 0x752   :  { %v1751_v39 = vpop.f32.mrf.mxu1  ;;  %1772 = vmatmul.mubr.msk.f32.gmra.mxu0 %vm626_vm6, %v1248_v38 }
 0x753   :  { %vm1243_vm13 = vcmp.gt.f32.partialorder %v1238_v37, 0.0  ;;  %v1246_v40 = vmul.f32 0.01, %v1238_v37  ;;  %1774 = vmatprep.mubr.msk.f32.mxu0 %vm1819_vm0, %v1818_v0 }
 0x755   :  { %v1249_v41 = vsel %vm1243_vm13, %v1238_v37, %v1246_v40 }
 0x756   :  { %1775 = vmatmul.mubr.msk.f32.gmra.mxu0 %vm626_vm6, %v1249_v41 }
 0x80e   :  { %v1340_v47 = vpop.f32.mrf.mxu0 }
 0x80f   :  { %v1341_v49 = vadd.f32 %v1542_v46, %v1340_v47 }
 0x810   :  { %v1770_v50 = vpop.f32.mrf.mxu0 }
 0x811   :  { %vm1354_vm14 = vcmp.gt.f32.partialorder %v1341_v49, 0.0  ;;  %v1357_v51 = vmul.f32 0.01, %v1341_v49 }
 0x812   :  { %v1345_v52 = vpop.f32.mrf.mxu0 }
 0x813   :  { %v1360_v54 = vsel %vm1354_vm14, %v1341_v49, %v1357_v51  ;;  %v1346_v56 = vadd.f32 %v1542_v46, %v1345_v52 }
 0x814   :  { %v1363_v57 = vadd.f32 %v1360_v54, %v2355_v14  ;;  %v1773_v59 = vpop.f32.mrf.mxu0 }
 0x815   :  { %vm1355_vm15 = vcmp.gt.f32.partialorder %v1346_v56, 0.0  ;;  %v1358_v61 = vmul.f32 0.01, %v1346_v56 }
 0x816   :  { %v1373_v62 = vmul.f32 %v1546_v55, %v1363_v57  ;;  %v1350_v63 = vpop.f32.mrf.mxu0 }
 0x817   :  { %v1361_v1 = vsel %vm1355_vm15, %v1346_v56, %v1358_v61  ;;  %v1351_v2 = vadd.f32 %v1542_v46, %v1350_v63 }
 0x818   :  { %v1383_v3 = vadd.f32 %v1547_v60, %v1373_v62  ;;  %v1364_v4 = vadd.f32 %v1361_v1, %v2362_v21  ;;  %v1776_v5 = vpop.f32.mrf.mxu0 }
 0x819   :  { %vm1356_vm1 = vcmp.gt.f32.partialorder %v1351_v2, 0.0  ;;  %v1359_v6 = vmul.f32 0.01, %v1351_v2 }
 0x81a   :  { %v1374_v7 = vmul.f32 %v1546_v55, %v1364_v4  ;;  %1786 = vmatmul.mubr.msk.f32.vlgmr.msra.gmra.mxu1 %vm200_vm3, %v1383_v3 }
 0x81b   :  { %v1362_v8 = vsel %vm1356_vm1, %v1351_v2, %v1359_v6  ;;  %1788 = vmatprep.mubr.msk.f32.mxu1 %vm1819_vm0, %v1818_v0 }
 0x81c   :  { %v1365_v9 = vadd.f32 %v1362_v8, %v2368_v23  ;;  %v1384_v10 = vadd.f32 %v1547_v60, %v1374_v7 }
 0x81e   :  { %v1375_v11 = vmul.f32 %v1546_v55, %v1365_v9  ;;  %1789 = vmatmul.mubr.msk.f32.gmra.mxu1 %vm200_vm3, %v1384_v10 }
 0x81f   :  { %1791 = vmatprep.mubr.msk.f32.mxu1 %vm1819_vm0, %v1818_v0 }
 0x820   :  { %v1385_v12 = vadd.f32 %v1547_v60, %v1375_v11 }
 0x822   :  { %1792 = vmatmul.mubr.msk.f32.gmra.mxu1 %vm200_vm3, %v1385_v12 }
 0x8da   :  { %v1472_v13 = vpop.f32.mrf.mxu1 }
 0x8db   :  { %v1473_v14 = vadd.f32 %v1548_v48, %v1472_v13 }
 0x8dc   :  { %v1787_v15 = vpop.f32.mrf.mxu1 }
 0x8dd   :  { %vm1486_vm2 = vcmp.gt.f32.partialorder %v1473_v14, 0.0  ;;  %v1489_v16 = vmul.f32 0.01, %v1473_v14 }
 0x8de   :  { %v1477_v17 = vpop.f32.mrf.mxu1 }
 0x8df   :  { %v1492_v18 = vsel %vm1486_vm2, %v1473_v14, %v1489_v16  ;;  %v1478_v19 = vadd.f32 %v1548_v48, %v1477_v17 }
 0x8e0   :  { %1496 = vst.msk [vmem:[%s2465_s24] sm:$0xff] %vm1495_vm4, %v1492_v18  ;;  %v1790_v0 = vpop.f32.mrf.mxu1 }
 0x8e1   :  { %vm1487_vm0 = vcmp.gt.f32.partialorder %v1478_v19, 0.0  ;;  %v1490_v20 = vmul.f32 0.01, %v1478_v19 }
 0x8e2   :  { %v1482_v53 = vpop.f32.mrf.mxu1 }
 0x8e3   :  { %v1493_v21 = vsel %vm1487_vm0, %v1478_v19, %v1490_v20  ;;  %v1483_v22 = vadd.f32 %v1548_v48, %v1482_v53 }
 0x8e4   :  { %1497 = vst.msk [vmem:[%s2465_s24 + $0x8] sm:$0xff] %vm1495_vm4, %v1493_v21  ;;  %v1793_v23 = vpop.f32.mrf.mxu1 }
 0x8e5   :  { %vm1488_vm3 = vcmp.gt.f32.partialorder %v1483_v22, 0.0  ;;  %v1491_v58 = vmul.f32 0.01, %v1483_v22 }
 0x8e7   :  { %v1494_v24 = vsel %vm1488_vm3, %v1483_v22, %v1491_v58 }
 0x8e8   :  { %1499 = vst.msk [vmem:[%s2465_s24 + $0x10] sm:$0xf] %vm1498_vm5, %v1494_v24 }

</bundles_post_ra>
